<compile_context>
chip_gen: v6e
topology: v6e:2x2x1
jax: 0.10.0
libtpu: 0.0.40
codegen_flags: <defaults>
</compile_context>

<pallas_src>
import functools

import jax
import jax.numpy as jnp
from jax.experimental import pallas as pl
from jax.experimental.pallas import tpu as pltpu


# ----------------------------- in-kernel helpers -----------------------------

def _mm_t(a, b):
    """a:(M,K) x b:(Nout,K) -> (M,Nout), contracting the last dim of both.

    This is exactly `a @ b.T` for torch-layout Linear weights, but expressed
    as a dot_general so no physical transpose / XLU copy is materialized and
    accumulation happens in f32 on the MXU.
    """
    return jax.lax.dot_general(
        a, b, (((1,), (1,)), ((), ())), preferred_element_type=jnp.float32)


def _layer_norm(x, w, b, eps):
    """LayerNorm over the last axis, all math in f32 (matches nn.LayerNorm)."""
    mu = jnp.mean(x, axis=-1, keepdims=True)
    xc = x - mu
    var = jnp.mean(xc * xc, axis=-1, keepdims=True)
    return xc * jax.lax.rsqrt(var + eps) * w + b


def _gelu_tanh(x):
    # TODO(synk): PyTorch nn.GELU default is the exact erf form; the tanh
    # approximation is used here because lax.erf has no guaranteed Mosaic
    # lowering (max abs deviation ~3e-4, far below the bf16 matmul noise).
    c = 0.7978845608028654  # sqrt(2/pi)
    return 0.5 * x * (1.0 + jnp.tanh(c * (x + 0.044715 * x * x * x)))


# --------------------------------- the kernel --------------------------------

def _block_kernel(x_ref, ln1w_ref, ln1b_ref, wqkv_ref, wproj_ref, bproj_ref,
                  ln2w_ref, ln2b_ref, wfc1_ref, bfc1_ref, wfc2_ref, bfc2_ref,
                  o_ref, attn_ref, *, num_heads, head_dim, scale, eps):
    H, hd = num_heads, head_dim
    C = H * hd
    bt = x_ref.shape[0]                  # batch elements handled per grid step
    mm_dtype = wqkv_ref.dtype            # matmul operand dtype (bf16)

    # Parameters are full-array VMEM residents (constant index maps).
    ln1_w, ln1_b = ln1w_ref[...], ln1b_ref[...]
    ln2_w, ln2_b = ln2w_ref[...], ln2b_ref[...]
    w_qkv, w_proj = wqkv_ref[...], wproj_ref[...]
    w_fc1, w_fc2 = wfc1_ref[...], wfc2_ref[...]
    b_proj, b_fc1, b_fc2 = bproj_ref[...], bfc1_ref[...], bfc2_ref[...]

    for b in range(bt):                                    # static unroll
        x = x_ref[b].astype(jnp.float32)                   # (N, C)

        # ---------------- x + Attention(norm1(x)) ----------------
        xn = _layer_norm(x, ln1_w, ln1_b, eps)
        qkv = _mm_t(xn.astype(mm_dtype), w_qkv)            # (N, 3C), f32

        # Fold the 1/sqrt(hd) scale into q once (cheaper than scaling scores).
        q_all = (qkv[:, 0:C] * scale).astype(mm_dtype)
        k_all = qkv[:, C:2 * C].astype(mm_dtype)
        v_all = qkv[:, 2 * C:3 * C].astype(mm_dtype)

        for h in range(H):                                  # static unroll
            c0 = h * hd
            q = q_all[:, c0:c0 + hd]                        # (N, hd)
            k = k_all[:, c0:c0 + hd]
            v = v_all[:, c0:c0 + hd]

            s = _mm_t(q, k)                                 # (N, N) f32, no k.T
            s = s - jnp.max(s, axis=-1, keepdims=True)
            p = jnp.exp(s)
            p = p * pl.reciprocal(jnp.sum(p, axis=-1, keepdims=True),
                                  approx=True)
            # Write this head's output straight into the scratch accumulator
            # (no concatenate, no H live score tensors).
            attn_ref[:, c0:c0 + hd] = jnp.dot(
                p.astype(mm_dtype), v, preferred_element_type=jnp.float32)

        y = _mm_t(attn_ref[...].astype(mm_dtype), w_proj) + b_proj
        h1 = x + y                                          # residual (f32)

        # ---------------- h1 + Mlp(norm2(h1)) ----------------
        hn = _layer_norm(h1, ln2_w, ln2_b, eps)
        z = _mm_t(hn.astype(mm_dtype), w_fc1) + b_fc1       # (N, hidden)
        z = _gelu_tanh(z)
        m = _mm_t(z.astype(mm_dtype), w_fc2) + b_fc2        # (N, C)

        o_ref[b] = (h1 + m).astype(o_ref.dtype)


# --------------------------------- wrapper ------------------------------------

def _pick_block_batch(B, N):
    """Batch elements per grid step: amortize per-step overhead but keep the
    parallel grid >= 2 steps so both v7x TensorCores get work."""
    max_rows = 1024
    bt = max(1, min(B // 2 if B >= 2 else 1, max(1, max_rows // max(N, 1))))
    while B % bt:
        bt -= 1
    return max(bt, 1)


def prepare_block_params(params, matmul_dtype=jnp.bfloat16):
    """One-time packing of torch-layout Block parameters into kernel layout.

    Call this ONCE outside the hot path. Matmul weights are only cast to
    `matmul_dtype` (torch (out_features, in_features) orientation is kept --
    the kernel contracts in_features via dot_general, so no transpose ever
    touches HBM); 1-D vectors are reshaped to (1, D) for clean 2-D VMEM tiles.
    """
    row = lambda v: jnp.asarray(v).reshape(1, -1).astype(jnp.float32)
    return {
        "ln1_w": row(params["ln1_w"]), "ln1_b": row(params["ln1_b"]),
        "w_qkv": jnp.asarray(params["w_qkv"]).astype(matmul_dtype),
        "w_proj": jnp.asarray(params["w_proj"]).astype(matmul_dtype),
        "b_proj": row(params["b_proj"]),
        "ln2_w": row(params["ln2_w"]), "ln2_b": row(params["ln2_b"]),
        "w_fc1": jnp.asarray(params["w_fc1"]).astype(matmul_dtype),
        "b_fc1": row(params["b_fc1"]),
        "w_fc2": jnp.asarray(params["w_fc2"]).astype(matmul_dtype),
        "b_fc2": row(params["b_fc2"]),
    }


def block_forward_pallas(x, kparams, *, num_heads, eps=1e-5, block_batch=None):
    """x: (B, N, C) f32; kparams: output of prepare_block_params."""
    B, N, C = x.shape
    head_dim = C // num_heads
    hidden = kparams["w_fc1"].shape[0]

    bt = _pick_block_batch(B, N) if block_batch is None else block_batch
    assert B % bt == 0, "block batch must divide B"

    kernel = functools.partial(
        _block_kernel, num_heads=num_heads, head_dim=head_dim,
        scale=head_dim ** (-0.5), eps=eps)

    const = lambda i: (0, 0)        # weights: resident in VMEM across steps

    return pl.pallas_call(
        kernel,
        out_shape=jax.ShapeDtypeStruct((B, N, C), x.dtype),
        grid_spec=pltpu.PrefetchScalarGridSpec(
            num_scalar_prefetch=0,
            grid=(B // bt,),
            in_specs=[
                pl.BlockSpec((bt, N, C), lambda i: (i, 0, 0)),   # x
                pl.BlockSpec((1, C), const),                     # ln1 weight
                pl.BlockSpec((1, C), const),                     # ln1 bias
                pl.BlockSpec((3 * C, C), const),                 # qkv weight
                pl.BlockSpec((C, C), const),                     # proj weight
                pl.BlockSpec((1, C), const),                     # proj bias
                pl.BlockSpec((1, C), const),                     # ln2 weight
                pl.BlockSpec((1, C), const),                     # ln2 bias
                pl.BlockSpec((hidden, C), const),                # fc1 weight
                pl.BlockSpec((1, hidden), const),                # fc1 bias
                pl.BlockSpec((C, hidden), const),                # fc2 weight
                pl.BlockSpec((1, C), const),                     # fc2 bias
            ],
            out_specs=pl.BlockSpec((bt, N, C), lambda i: (i, 0, 0)),
            scratch_shapes=[pltpu.VMEM((N, C), jnp.float32)],    # head concat
        ),
        compiler_params=pltpu.CompilerParams(
            dimension_semantics=("parallel",)),
    )(x, kparams["ln1_w"], kparams["ln1_b"], kparams["w_qkv"],
      kparams["w_proj"], kparams["b_proj"], kparams["ln2_w"], kparams["ln2_b"],
      kparams["w_fc1"], kparams["b_fc1"], kparams["w_fc2"], kparams["b_fc2"])


# ------------------------------- pure-JAX reference ---------------------------

def block_ref(x, params, *, num_heads, eps=1e-5):
    """Pure-JAX f32 reference mirroring the PyTorch Block forward exactly."""
    B, N, C = x.shape
    H = num_heads
    hd = C // H
    scale = hd ** (-0.5)

    def ln(v, w, b):
        mu = jnp.mean(v, axis=-1, keepdims=True)
        var = jnp.mean((v - mu) ** 2, axis=-1, keepdims=True)
        return (v - mu) / jnp.sqrt(var + eps) * w + b

    # x = x + Attention(norm1(x))
    xn = ln(x, params["ln1_w"], params["ln1_b"])
    qkv = xn @ params["w_qkv"].T
    qkv = qkv.reshape(B, N, 3, H, hd).transpose(2, 0, 3, 1, 4)
    q, k, v = qkv[0], qkv[1], qkv[2]
    attn = jnp.einsum("bhqd,bhkd->bhqk", q, k) * scale
    attn = jax.nn.softmax(attn, axis=-1)
    y = jnp.einsum("bhqk,bhkd->bhqd", attn, v)
    y = y.transpose(0, 2, 1, 3).reshape(B, N, C)
    y = y @ params["w_proj"].T + params["b_proj"]
    h = x + y

    # x = x + Mlp(norm2(x))
    hn = ln(h, params["ln2_w"], params["ln2_b"])
    z = jax.nn.gelu(hn @ params["w_fc1"].T + params["b_fc1"], approximate=False)
    m = z @ params["w_fc2"].T + params["b_fc2"]
    return h + m


def init_block_params(key, dim, mlp_ratio=4.0):
    """Deterministic torch-layout parameters (shapes from the nn.Module)."""
    hidden = int(dim * mlp_ratio)
    ks = jax.random.split(key, 10)
    nrm = lambda k, shape, s: s * jax.random.normal(k, shape, dtype=jnp.float32)
    return {
        "ln1_w": 1.0 + nrm(ks[0], (dim,), 0.1),
        "ln1_b": nrm(ks[1], (dim,), 0.05),
        "w_qkv": nrm(ks[2], (3 * dim, dim), 0.05),       # nn.Linear(dim, 3*dim)
        "w_proj": nrm(ks[3], (dim, dim), 0.05),          # nn.Linear(dim, dim)
        "b_proj": nrm(ks[4], (dim,), 0.05),
        "ln2_w": 1.0 + nrm(ks[5], (dim,), 0.1),
        "ln2_b": nrm(ks[6], (dim,), 0.05),
        "w_fc1": nrm(ks[7], (hidden, dim), 0.05),        # nn.Linear(dim, hidden)
        "b_fc1": nrm(ks[8], (hidden,), 0.05),
        "w_fc2": nrm(ks[9], (dim, hidden), 0.05),        # nn.Linear(hidden, dim)
        "b_fc2": nrm(jax.random.fold_in(key, 123), (dim,), 0.05),
    }


if __name__ == "__main__":
    # Small shapes consistent with the module: B=2, N=8 tokens, C=32 hidden,
    # 4 heads (head_dim=8), mlp_ratio=4 -> hidden=128.
    B, N, C = 2, 8, 32
    num_heads = 4
    mlp_ratio = 4.0

    key = jax.random.PRNGKey(0)
    kx, kp = jax.random.split(key)
    x = jax.random.normal(kx, (B, N, C), dtype=jnp.float32)
    params = init_block_params(kp, C, mlp_ratio=mlp_ratio)

    # One-time parameter packing (outside the hot path): bf16 matmul weights,
    # torch orientation preserved, biases as (1, D).
    kparams = prepare_block_params(params)

    out = block_forward_pallas(x, kparams, num_heads=num_heads)
    out = jax.block_until_ready(out)

    ref = block_ref(x, params, num_heads=num_heads)
    assert out.shape == (B, N, C)
    max_err = float(jnp.max(jnp.abs(out - ref)))
    # Tolerance budget is dominated by the bf16 matmul operands (~1e-3 abs);
    # LayerNorm / softmax / residual math stays in f32.
    assert jnp.allclose(out, ref, atol=1e-2, rtol=1e-2), (
        f"mismatch vs reference, max abs err = {max_err}")

    print("KERNEL_OK")
</pallas_src>

<mosaic_0001>
module attributes {stable_mosaic.version = 11 : i64} {
  func.func @_block_kernel(%arg0: i32, %arg1: memref<1x8x32xf32, #tpu.memory_space<vmem>>, %arg2: memref<1x32xf32, #tpu.memory_space<vmem>>, %arg3: memref<1x32xf32, #tpu.memory_space<vmem>>, %arg4: memref<96x32xbf16, #tpu.memory_space<vmem>>, %arg5: memref<32x32xbf16, #tpu.memory_space<vmem>>, %arg6: memref<1x32xf32, #tpu.memory_space<vmem>>, %arg7: memref<1x32xf32, #tpu.memory_space<vmem>>, %arg8: memref<1x32xf32, #tpu.memory_space<vmem>>, %arg9: memref<128x32xbf16, #tpu.memory_space<vmem>>, %arg10: memref<1x128xf32, #tpu.memory_space<vmem>>, %arg11: memref<32x128xbf16, #tpu.memory_space<vmem>>, %arg12: memref<1x32xf32, #tpu.memory_space<vmem>>, %arg13: memref<1x8x32xf32, #tpu.memory_space<vmem>>, %arg14: memref<8x32xf32, #tpu.memory_space<vmem>>) attributes {dimension_semantics = [#tpu.dimension_semantics<parallel>], iteration_bounds = array<i64: 2>, scalar_prefetch = 0 : i64, scratch_operands = 1 : i64, tpu.core_type = #tpu.core_type<tc>, window_params = [{transform_indices = @transform_0, window_bounds = array<i64: 1, 8, 32>}, {pipeline_mode = #tpu.pipeline_mode<synchronous>, transform_indices = @transform_1, window_bounds = array<i64: 1, 32>}, {pipeline_mode = #tpu.pipeline_mode<synchronous>, transform_indices = @transform_2, window_bounds = array<i64: 1, 32>}, {pipeline_mode = #tpu.pipeline_mode<synchronous>, transform_indices = @transform_3, window_bounds = array<i64: 96, 32>}, {pipeline_mode = #tpu.pipeline_mode<synchronous>, transform_indices = @transform_4, window_bounds = array<i64: 32, 32>}, {pipeline_mode = #tpu.pipeline_mode<synchronous>, transform_indices = @transform_5, window_bounds = array<i64: 1, 32>}, {pipeline_mode = #tpu.pipeline_mode<synchronous>, transform_indices = @transform_6, window_bounds = array<i64: 1, 32>}, {pipeline_mode = #tpu.pipeline_mode<synchronous>, transform_indices = @transform_7, window_bounds = array<i64: 1, 32>}, {pipeline_mode = #tpu.pipeline_mode<synchronous>, transform_indices = @transform_8, window_bounds = array<i64: 128, 32>}, {pipeline_mode = #tpu.pipeline_mode<synchronous>, transform_indices = @transform_9, window_bounds = array<i64: 1, 128>}, {pipeline_mode = #tpu.pipeline_mode<synchronous>, transform_indices = @transform_10, window_bounds = array<i64: 32, 128>}, {pipeline_mode = #tpu.pipeline_mode<synchronous>, transform_indices = @transform_11, window_bounds = array<i64: 1, 32>}, {transform_indices = @transform_12, window_bounds = array<i64: 1, 8, 32>}]} {
    %c0 = arith.constant 0 : index
    %c0_0 = arith.constant 0 : index
    %0 = vector.load %arg2[%c0, %c0_0] : memref<1x32xf32, #tpu.memory_space<vmem>>, vector<1x32xf32>
    %c0_1 = arith.constant 0 : index
    %c0_2 = arith.constant 0 : index
    %1 = vector.load %arg3[%c0_1, %c0_2] : memref<1x32xf32, #tpu.memory_space<vmem>>, vector<1x32xf32>
    %c0_3 = arith.constant 0 : index
    %c0_4 = arith.constant 0 : index
    %2 = vector.load %arg7[%c0_3, %c0_4] : memref<1x32xf32, #tpu.memory_space<vmem>>, vector<1x32xf32>
    %c0_5 = arith.constant 0 : index
    %c0_6 = arith.constant 0 : index
    %3 = vector.load %arg8[%c0_5, %c0_6] : memref<1x32xf32, #tpu.memory_space<vmem>>, vector<1x32xf32>
    %c0_7 = arith.constant 0 : index
    %c0_8 = arith.constant 0 : index
    %4 = vector.load %arg4[%c0_7, %c0_8] : memref<96x32xbf16, #tpu.memory_space<vmem>>, vector<96x32xbf16>
    %c0_9 = arith.constant 0 : index
    %c0_10 = arith.constant 0 : index
    %5 = vector.load %arg5[%c0_9, %c0_10] : memref<32x32xbf16, #tpu.memory_space<vmem>>, vector<32x32xbf16>
    %c0_11 = arith.constant 0 : index
    %c0_12 = arith.constant 0 : index
    %6 = vector.load %arg9[%c0_11, %c0_12] : memref<128x32xbf16, #tpu.memory_space<vmem>>, vector<128x32xbf16>
    %c0_13 = arith.constant 0 : index
    %c0_14 = arith.constant 0 : index
    %7 = vector.load %arg11[%c0_13, %c0_14] : memref<32x128xbf16, #tpu.memory_space<vmem>>, vector<32x128xbf16>
    %c0_15 = arith.constant 0 : index
    %c0_16 = arith.constant 0 : index
    %8 = vector.load %arg6[%c0_15, %c0_16] : memref<1x32xf32, #tpu.memory_space<vmem>>, vector<1x32xf32>
    %c0_17 = arith.constant 0 : index
    %c0_18 = arith.constant 0 : index
    %9 = vector.load %arg10[%c0_17, %c0_18] : memref<1x128xf32, #tpu.memory_space<vmem>>, vector<1x128xf32>
    %c0_19 = arith.constant 0 : index
    %c0_20 = arith.constant 0 : index
    %10 = vector.load %arg12[%c0_19, %c0_20] : memref<1x32xf32, #tpu.memory_space<vmem>>, vector<1x32xf32>
    %c0_21 = arith.constant 0 : index
    %c0_22 = arith.constant 0 : index
    %c0_23 = arith.constant 0 : index
    %11 = vector.load %arg1[%c0_21, %c0_22, %c0_23] : memref<1x8x32xf32, #tpu.memory_space<vmem>>, vector<1x8x32xf32>
    %12 = vector.shape_cast %11 : vector<1x8x32xf32> to vector<8x32xf32>
    %cst = arith.constant dense<0.000000e+00> : vector<8xf32>
    %13 = vector.multi_reduction <add>, %12, %cst [1] : vector<8x32xf32> to vector<8xf32>
    %14 = vector.shape_cast %13 : vector<8xf32> to vector<8x1xf32>
    %cst_24 = arith.constant 3.200000e+01 : f32
    %15 = vector.broadcast %cst_24 : f32 to vector<8x1xf32>
    %16 = arith.divf %14, %15 : vector<8x1xf32>
    %17 = vector.broadcast %16 : vector<8x1xf32> to vector<8x32xf32>
    %18 = arith.subf %12, %17 : vector<8x32xf32>
    %19 = arith.mulf %18, %18 : vector<8x32xf32>
    %cst_25 = arith.constant dense<0.000000e+00> : vector<8xf32>
    %20 = vector.multi_reduction <add>, %19, %cst_25 [1] : vector<8x32xf32> to vector<8xf32>
    %21 = vector.shape_cast %20 : vector<8xf32> to vector<8x1xf32>
    %cst_26 = arith.constant 3.200000e+01 : f32
    %22 = vector.broadcast %cst_26 : f32 to vector<8x1xf32>
    %23 = arith.divf %21, %22 : vector<8x1xf32>
    %cst_27 = arith.constant 9.99999974E-6 : f32
    %24 = vector.broadcast %cst_27 : f32 to vector<8x1xf32>
    %25 = arith.addf %23, %24 : vector<8x1xf32>
    %26 = math.rsqrt %25 : vector<8x1xf32>
    %27 = vector.broadcast %26 : vector<8x1xf32> to vector<8x32xf32>
    %28 = arith.mulf %18, %27 : vector<8x32xf32>
    %29 = vector.broadcast %0 : vector<1x32xf32> to vector<8x32xf32>
    %30 = arith.mulf %28, %29 : vector<8x32xf32>
    %31 = vector.broadcast %1 : vector<1x32xf32> to vector<8x32xf32>
    %32 = arith.addf %30, %31 : vector<8x32xf32>
    %33 = arith.truncf %32 : vector<8x32xf32> to vector<8x32xbf16>
    %cst_28 = arith.constant dense<0.000000e+00> : vector<8x96xf32>
    %34 = tpu.matmul %33, %4, %cst_28 {dimension_numbers = #tpu.dot_dimension_numbers<[1], [1], [0], [0], [0, 0, 1, 0], [], []>} : vector<8x32xbf16>, vector<96x32xbf16>, vector<8x96xf32> -> vector<8x96xf32>
    %35 = vector.extract_strided_slice %34 {offsets = [0, 0], sizes = [8, 32], strides = [1, 1]} : vector<8x96xf32> to vector<8x32xf32>
    %cst_29 = arith.constant 0.353553385 : f32
    %36 = vector.broadcast %cst_29 : f32 to vector<8x32xf32>
    %37 = arith.mulf %35, %36 : vector<8x32xf32>
    %38 = arith.truncf %37 : vector<8x32xf32> to vector<8x32xbf16>
    %39 = vector.extract_strided_slice %34 {offsets = [0, 32], sizes = [8, 32], strides = [1, 1]} : vector<8x96xf32> to vector<8x32xf32>
    %40 = arith.truncf %39 : vector<8x32xf32> to vector<8x32xbf16>
    %41 = vector.extract_strided_slice %34 {offsets = [0, 64], sizes = [8, 32], strides = [1, 1]} : vector<8x96xf32> to vector<8x32xf32>
    %42 = arith.truncf %41 : vector<8x32xf32> to vector<8x32xbf16>
    %43 = vector.extract_strided_slice %38 {offsets = [0, 0], sizes = [8, 8], strides = [1, 1]} : vector<8x32xbf16> to vector<8x8xbf16>
    %44 = vector.extract_strided_slice %40 {offsets = [0, 0], sizes = [8, 8], strides = [1, 1]} : vector<8x32xbf16> to vector<8x8xbf16>
    %45 = vector.extract_strided_slice %42 {offsets = [0, 0], sizes = [8, 8], strides = [1, 1]} : vector<8x32xbf16> to vector<8x8xbf16>
    %cst_30 = arith.constant dense<0.000000e+00> : vector<8x8xf32>
    %46 = tpu.matmul %43, %44, %cst_30 {dimension_numbers = #tpu.dot_dimension_numbers<[1], [1], [0], [0], [0, 0, 1, 0], [], []>} : vector<8x8xbf16>, vector<8x8xbf16>, vector<8x8xf32> -> vector<8x8xf32>
    %cst_31 = arith.constant dense<0xFF800000> : vector<8xf32>
    %47 = vector.multi_reduction <maximumf>, %46, %cst_31 [1] : vector<8x8xf32> to vector<8xf32>
    %48 = vector.shape_cast %47 : vector<8xf32> to vector<8x1xf32>
    %49 = vector.broadcast %48 : vector<8x1xf32> to vector<8x8xf32>
    %50 = arith.subf %46, %49 : vector<8x8xf32>
    %51 = math.exp %50 : vector<8x8xf32>
    %cst_32 = arith.constant dense<0.000000e+00> : vector<8xf32>
    %52 = vector.multi_reduction <add>, %51, %cst_32 [1] : vector<8x8xf32> to vector<8xf32>
    %53 = vector.shape_cast %52 : vector<8xf32> to vector<8x1xf32>
    %54 = tpu.reciprocal %53 {approx = true} : vector<8x1xf32> -> vector<8x1xf32>
    %55 = vector.broadcast %54 : vector<8x1xf32> to vector<8x8xf32>
    %56 = arith.mulf %51, %55 : vector<8x8xf32>
    %57 = arith.truncf %56 : vector<8x8xf32> to vector<8x8xbf16>
    %cst_33 = arith.constant dense<0.000000e+00> : vector<8x8xf32>
    %58 = tpu.matmul %57, %45, %cst_33 {dimension_numbers = #tpu.dot_dimension_numbers<[1], [0], [0], [1], [0, 0, 1, 1], [], []>} : vector<8x8xbf16>, vector<8x8xbf16>, vector<8x8xf32> -> vector<8x8xf32>
    %c0_34 = arith.constant 0 : index
    %c0_35 = arith.constant 0 : index
    %59 = vector.load %arg14[%c0_34, %c0_35] : memref<8x32xf32, #tpu.memory_space<vmem>>, vector<8x8xf32>
    tpu.vector_store %arg14[%c0_34, %c0_35], %58 {strides = array<i32>} : memref<8x32xf32, #tpu.memory_space<vmem>>, vector<8x8xf32>,
    %60 = vector.extract_strided_slice %38 {offsets = [0, 8], sizes = [8, 8], strides = [1, 1]} : vector<8x32xbf16> to vector<8x8xbf16>
    %61 = vector.extract_strided_slice %40 {offsets = [0, 8], sizes = [8, 8], strides = [1, 1]} : vector<8x32xbf16> to vector<8x8xbf16>
    %62 = vector.extract_strided_slice %42 {offsets = [0, 8], sizes = [8, 8], strides = [1, 1]} : vector<8x32xbf16> to vector<8x8xbf16>
    %cst_36 = arith.constant dense<0.000000e+00> : vector<8x8xf32>
    %63 = tpu.matmul %60, %61, %cst_36 {dimension_numbers = #tpu.dot_dimension_numbers<[1], [1], [0], [0], [0, 0, 1, 0], [], []>} : vector<8x8xbf16>, vector<8x8xbf16>, vector<8x8xf32> -> vector<8x8xf32>
    %cst_37 = arith.constant dense<0xFF800000> : vector<8xf32>
    %64 = vector.multi_reduction <maximumf>, %63, %cst_37 [1] : vector<8x8xf32> to vector<8xf32>
    %65 = vector.shape_cast %64 : vector<8xf32> to vector<8x1xf32>
    %66 = vector.broadcast %65 : vector<8x1xf32> to vector<8x8xf32>
    %67 = arith.subf %63, %66 : vector<8x8xf32>
    %68 = math.exp %67 : vector<8x8xf32>
    %cst_38 = arith.constant dense<0.000000e+00> : vector<8xf32>
    %69 = vector.multi_reduction <add>, %68, %cst_38 [1] : vector<8x8xf32> to vector<8xf32>
    %70 = vector.shape_cast %69 : vector<8xf32> to vector<8x1xf32>
    %71 = tpu.reciprocal %70 {approx = true} : vector<8x1xf32> -> vector<8x1xf32>
    %72 = vector.broadcast %71 : vector<8x1xf32> to vector<8x8xf32>
    %73 = arith.mulf %68, %72 : vector<8x8xf32>
    %74 = arith.truncf %73 : vector<8x8xf32> to vector<8x8xbf16>
    %cst_39 = arith.constant dense<0.000000e+00> : vector<8x8xf32>
    %75 = tpu.matmul %74, %62, %cst_39 {dimension_numbers = #tpu.dot_dimension_numbers<[1], [0], [0], [1], [0, 0, 1, 1], [], []>} : vector<8x8xbf16>, vector<8x8xbf16>, vector<8x8xf32> -> vector<8x8xf32>
    %c0_40 = arith.constant 0 : index
    %c8 = arith.constant 8 : index
    %76 = vector.load %arg14[%c0_40, %c8] : memref<8x32xf32, #tpu.memory_space<vmem>>, vector<8x8xf32>
    tpu.vector_store %arg14[%c0_40, %c8], %75 {strides = array<i32>} : memref<8x32xf32, #tpu.memory_space<vmem>>, vector<8x8xf32>,
    %77 = vector.extract_strided_slice %38 {offsets = [0, 16], sizes = [8, 8], strides = [1, 1]} : vector<8x32xbf16> to vector<8x8xbf16>
    %78 = vector.extract_strided_slice %40 {offsets = [0, 16], sizes = [8, 8], strides = [1, 1]} : vector<8x32xbf16> to vector<8x8xbf16>
    %79 = vector.extract_strided_slice %42 {offsets = [0, 16], sizes = [8, 8], strides = [1, 1]} : vector<8x32xbf16> to vector<8x8xbf16>
    %cst_41 = arith.constant dense<0.000000e+00> : vector<8x8xf32>
    %80 = tpu.matmul %77, %78, %cst_41 {dimension_numbers = #tpu.dot_dimension_numbers<[1], [1], [0], [0], [0, 0, 1, 0], [], []>} : vector<8x8xbf16>, vector<8x8xbf16>, vector<8x8xf32> -> vector<8x8xf32>
    %cst_42 = arith.constant dense<0xFF800000> : vector<8xf32>
    %81 = vector.multi_reduction <maximumf>, %80, %cst_42 [1] : vector<8x8xf32> to vector<8xf32>
    %82 = vector.shape_cast %81 : vector<8xf32> to vector<8x1xf32>
    %83 = vector.broadcast %82 : vector<8x1xf32> to vector<8x8xf32>
    %84 = arith.subf %80, %83 : vector<8x8xf32>
    %85 = math.exp %84 : vector<8x8xf32>
    %cst_43 = arith.constant dense<0.000000e+00> : vector<8xf32>
    %86 = vector.multi_reduction <add>, %85, %cst_43 [1] : vector<8x8xf32> to vector<8xf32>
    %87 = vector.shape_cast %86 : vector<8xf32> to vector<8x1xf32>
    %88 = tpu.reciprocal %87 {approx = true} : vector<8x1xf32> -> vector<8x1xf32>
    %89 = vector.broadcast %88 : vector<8x1xf32> to vector<8x8xf32>
    %90 = arith.mulf %85, %89 : vector<8x8xf32>
    %91 = arith.truncf %90 : vector<8x8xf32> to vector<8x8xbf16>
    %cst_44 = arith.constant dense<0.000000e+00> : vector<8x8xf32>
    %92 = tpu.matmul %91, %79, %cst_44 {dimension_numbers = #tpu.dot_dimension_numbers<[1], [0], [0], [1], [0, 0, 1, 1], [], []>} : vector<8x8xbf16>, vector<8x8xbf16>, vector<8x8xf32> -> vector<8x8xf32>
    %c0_45 = arith.constant 0 : index
    %c16 = arith.constant 16 : index
    %93 = vector.load %arg14[%c0_45, %c16] : memref<8x32xf32, #tpu.memory_space<vmem>>, vector<8x8xf32>
    tpu.vector_store %arg14[%c0_45, %c16], %92 {strides = array<i32>} : memref<8x32xf32, #tpu.memory_space<vmem>>, vector<8x8xf32>,
    %94 = vector.extract_strided_slice %38 {offsets = [0, 24], sizes = [8, 8], strides = [1, 1]} : vector<8x32xbf16> to vector<8x8xbf16>
    %95 = vector.extract_strided_slice %40 {offsets = [0, 24], sizes = [8, 8], strides = [1, 1]} : vector<8x32xbf16> to vector<8x8xbf16>
    %96 = vector.extract_strided_slice %42 {offsets = [0, 24], sizes = [8, 8], strides = [1, 1]} : vector<8x32xbf16> to vector<8x8xbf16>
    %cst_46 = arith.constant dense<0.000000e+00> : vector<8x8xf32>
    %97 = tpu.matmul %94, %95, %cst_46 {dimension_numbers = #tpu.dot_dimension_numbers<[1], [1], [0], [0], [0, 0, 1, 0], [], []>} : vector<8x8xbf16>, vector<8x8xbf16>, vector<8x8xf32> -> vector<8x8xf32>
    %cst_47 = arith.constant dense<0xFF800000> : vector<8xf32>
    %98 = vector.multi_reduction <maximumf>, %97, %cst_47 [1] : vector<8x8xf32> to vector<8xf32>
    %99 = vector.shape_cast %98 : vector<8xf32> to vector<8x1xf32>
    %100 = vector.broadcast %99 : vector<8x1xf32> to vector<8x8xf32>
    %101 = arith.subf %97, %100 : vector<8x8xf32>
    %102 = math.exp %101 : vector<8x8xf32>
    %cst_48 = arith.constant dense<0.000000e+00> : vector<8xf32>
    %103 = vector.multi_reduction <add>, %102, %cst_48 [1] : vector<8x8xf32> to vector<8xf32>
    %104 = vector.shape_cast %103 : vector<8xf32> to vector<8x1xf32>
    %105 = tpu.reciprocal %104 {approx = true} : vector<8x1xf32> -> vector<8x1xf32>
    %106 = vector.broadcast %105 : vector<8x1xf32> to vector<8x8xf32>
    %107 = arith.mulf %102, %106 : vector<8x8xf32>
    %108 = arith.truncf %107 : vector<8x8xf32> to vector<8x8xbf16>
    %cst_49 = arith.constant dense<0.000000e+00> : vector<8x8xf32>
    %109 = tpu.matmul %108, %96, %cst_49 {dimension_numbers = #tpu.dot_dimension_numbers<[1], [0], [0], [1], [0, 0, 1, 1], [], []>} : vector<8x8xbf16>, vector<8x8xbf16>, vector<8x8xf32> -> vector<8x8xf32>
    %c0_50 = arith.constant 0 : index
    %c24 = arith.constant 24 : index
    %110 = vector.load %arg14[%c0_50, %c24] : memref<8x32xf32, #tpu.memory_space<vmem>>, vector<8x8xf32>
    tpu.vector_store %arg14[%c0_50, %c24], %109 {strides = array<i32>} : memref<8x32xf32, #tpu.memory_space<vmem>>, vector<8x8xf32>,
    %c0_51 = arith.constant 0 : index
    %c0_52 = arith.constant 0 : index
    %111 = vector.load %arg14[%c0_51, %c0_52] : memref<8x32xf32, #tpu.memory_space<vmem>>, vector<8x32xf32>
    %112 = arith.truncf %111 : vector<8x32xf32> to vector<8x32xbf16>
    %cst_53 = arith.constant dense<0.000000e+00> : vector<8x32xf32>
    %113 = tpu.matmul %112, %5, %cst_53 {dimension_numbers = #tpu.dot_dimension_numbers<[1], [1], [0], [0], [0, 0, 1, 0], [], []>} : vector<8x32xbf16>, vector<32x32xbf16>, vector<8x32xf32> -> vector<8x32xf32>
    %114 = vector.broadcast %8 : vector<1x32xf32> to vector<8x32xf32>
    %115 = arith.addf %113, %114 : vector<8x32xf32>
    %116 = arith.addf %12, %115 : vector<8x32xf32>
    %cst_54 = arith.constant dense<0.000000e+00> : vector<8xf32>
    %117 = vector.multi_reduction <add>, %116, %cst_54 [1] : vector<8x32xf32> to vector<8xf32>
    %118 = vector.shape_cast %117 : vector<8xf32> to vector<8x1xf32>
    %cst_55 = arith.constant 3.200000e+01 : f32
    %119 = vector.broadcast %cst_55 : f32 to vector<8x1xf32>
    %120 = arith.divf %118, %119 : vector<8x1xf32>
    %121 = vector.broadcast %120 : vector<8x1xf32> to vector<8x32xf32>
    %122 = arith.subf %116, %121 : vector<8x32xf32>
    %123 = arith.mulf %122, %122 : vector<8x32xf32>
    %cst_56 = arith.constant dense<0.000000e+00> : vector<8xf32>
    %124 = vector.multi_reduction <add>, %123, %cst_56 [1] : vector<8x32xf32> to vector<8xf32>
    %125 = vector.shape_cast %124 : vector<8xf32> to vector<8x1xf32>
    %cst_57 = arith.constant 3.200000e+01 : f32
    %126 = vector.broadcast %cst_57 : f32 to vector<8x1xf32>
    %127 = arith.divf %125, %126 : vector<8x1xf32>
    %cst_58 = arith.constant 9.99999974E-6 : f32
    %128 = vector.broadcast %cst_58 : f32 to vector<8x1xf32>
    %129 = arith.addf %127, %128 : vector<8x1xf32>
    %130 = math.rsqrt %129 : vector<8x1xf32>
    %131 = vector.broadcast %130 : vector<8x1xf32> to vector<8x32xf32>
    %132 = arith.mulf %122, %131 : vector<8x32xf32>
    %133 = vector.broadcast %2 : vector<1x32xf32> to vector<8x32xf32>
    %134 = arith.mulf %132, %133 : vector<8x32xf32>
    %135 = vector.broadcast %3 : vector<1x32xf32> to vector<8x32xf32>
    %136 = arith.addf %134, %135 : vector<8x32xf32>
    %137 = arith.truncf %136 : vector<8x32xf32> to vector<8x32xbf16>
    %cst_59 = arith.constant dense<0.000000e+00> : vector<8x128xf32>
    %138 = tpu.matmul %137, %6, %cst_59 {dimension_numbers = #tpu.dot_dimension_numbers<[1], [1], [0], [0], [0, 0, 1, 0], [], []>} : vector<8x32xbf16>, vector<128x32xbf16>, vector<8x128xf32> -> vector<8x128xf32>
    %139 = vector.broadcast %9 : vector<1x128xf32> to vector<8x128xf32>
    %140 = arith.addf %138, %139 : vector<8x128xf32>
    %cst_60 = arith.constant 5.000000e-01 : f32
    %141 = vector.broadcast %cst_60 : f32 to vector<8x128xf32>
    %142 = arith.mulf %141, %140 : vector<8x128xf32>
    %cst_61 = arith.constant 4.471500e-02 : f32
    %143 = vector.broadcast %cst_61 : f32 to vector<8x128xf32>
    %144 = arith.mulf %143, %140 : vector<8x128xf32>
    %145 = arith.mulf %144, %140 : vector<8x128xf32>
    %146 = arith.mulf %145, %140 : vector<8x128xf32>
    %147 = arith.addf %140, %146 : vector<8x128xf32>
    %cst_62 = arith.constant 0.797884583 : f32
    %148 = vector.broadcast %cst_62 : f32 to vector<8x128xf32>
    %149 = arith.mulf %148, %147 : vector<8x128xf32>
    %150 = math.tanh %149 : vector<8x128xf32>
    %cst_63 = arith.constant 1.000000e+00 : f32
    %151 = vector.broadcast %cst_63 : f32 to vector<8x128xf32>
    %152 = arith.addf %151, %150 : vector<8x128xf32>
    %153 = arith.mulf %142, %152 : vector<8x128xf32>
    %154 = arith.truncf %153 : vector<8x128xf32> to vector<8x128xbf16>
    %cst_64 = arith.constant dense<0.000000e+00> : vector<8x32xf32>
    %155 = tpu.matmul %154, %7, %cst_64 {dimension_numbers = #tpu.dot_dimension_numbers<[1], [1], [0], [0], [0, 0, 1, 0], [], []>} : vector<8x128xbf16>, vector<32x128xbf16>, vector<8x32xf32> -> vector<8x32xf32>
    %156 = vector.broadcast %10 : vector<1x32xf32> to vector<8x32xf32>
    %157 = arith.addf %155, %156 : vector<8x32xf32>
    %158 = arith.addf %116, %157 : vector<8x32xf32>
    %c0_65 = arith.constant 0 : index
    %c0_66 = arith.constant 0 : index
    %c0_67 = arith.constant 0 : index
    %159 = vector.load %arg13[%c0_65, %c0_66, %c0_67] : memref<1x8x32xf32, #tpu.memory_space<vmem>>, vector<1x8x32xf32>
    %160 = vector.shape_cast %159 : vector<1x8x32xf32> to vector<8x32xf32>
    %161 = vector.shape_cast %158 : vector<8x32xf32> to vector<1x8x32xf32>
    tpu.vector_store %arg13[%c0_65, %c0_66, %c0_67], %161 {strides = array<i32>} : memref<1x8x32xf32, #tpu.memory_space<vmem>>, vector<1x8x32xf32>,
    return
  }
  func.func @transform_0(%arg0: i32) -> (i32, i32, i32) {
    %c0_i32 = arith.constant 0 : i32
    %c0_i32_0 = arith.constant 0 : i32
    %c0_i32_1 = arith.constant 0 : i32
    return %arg0, %c0_i32, %c0_i32_0 : i32, i32, i32
  }
  func.func @transform_1(%arg0: i32) -> (i32, i32) {
    %c0_i32 = arith.constant 0 : i32
    %c0_i32_0 = arith.constant 0 : i32
    %c0_i32_1 = arith.constant 0 : i32
    return %c0_i32, %c0_i32_0 : i32, i32
  }
  func.func @transform_2(%arg0: i32) -> (i32, i32) {
    %c0_i32 = arith.constant 0 : i32
    %c0_i32_0 = arith.constant 0 : i32
    %c0_i32_1 = arith.constant 0 : i32
    return %c0_i32, %c0_i32_0 : i32, i32
  }
  func.func @transform_3(%arg0: i32) -> (i32, i32) {
    %c0_i32 = arith.constant 0 : i32
    %c0_i32_0 = arith.constant 0 : i32
    %c0_i32_1 = arith.constant 0 : i32
    return %c0_i32, %c0_i32_0 : i32, i32
  }
  func.func @transform_4(%arg0: i32) -> (i32, i32) {
    %c0_i32 = arith.constant 0 : i32
    %c0_i32_0 = arith.constant 0 : i32
    %c0_i32_1 = arith.constant 0 : i32
    return %c0_i32, %c0_i32_0 : i32, i32
  }
  func.func @transform_5(%arg0: i32) -> (i32, i32) {
    %c0_i32 = arith.constant 0 : i32
    %c0_i32_0 = arith.constant 0 : i32
    %c0_i32_1 = arith.constant 0 : i32
    return %c0_i32, %c0_i32_0 : i32, i32
  }
  func.func @transform_6(%arg0: i32) -> (i32, i32) {
    %c0_i32 = arith.constant 0 : i32
    %c0_i32_0 = arith.constant 0 : i32
    %c0_i32_1 = arith.constant 0 : i32
    return %c0_i32, %c0_i32_0 : i32, i32
  }
  func.func @transform_7(%arg0: i32) -> (i32, i32) {
    %c0_i32 = arith.constant 0 : i32
    %c0_i32_0 = arith.constant 0 : i32
    %c0_i32_1 = arith.constant 0 : i32
    return %c0_i32, %c0_i32_0 : i32, i32
  }
  func.func @transform_8(%arg0: i32) -> (i32, i32) {
    %c0_i32 = arith.constant 0 : i32
    %c0_i32_0 = arith.constant 0 : i32
    %c0_i32_1 = arith.constant 0 : i32
    return %c0_i32, %c0_i32_0 : i32, i32
  }
  func.func @transform_9(%arg0: i32) -> (i32, i32) {
    %c0_i32 = arith.constant 0 : i32
    %c0_i32_0 = arith.constant 0 : i32
    %c0_i32_1 = arith.constant 0 : i32
    return %c0_i32, %c0_i32_0 : i32, i32
  }
  func.func @transform_10(%arg0: i32) -> (i32, i32) {
    %c0_i32 = arith.constant 0 : i32
    %c0_i32_0 = arith.constant 0 : i32
    %c0_i32_1 = arith.constant 0 : i32
    return %c0_i32, %c0_i32_0 : i32, i32
  }
  func.func @transform_11(%arg0: i32) -> (i32, i32) {
    %c0_i32 = arith.constant 0 : i32
    %c0_i32_0 = arith.constant 0 : i32
    %c0_i32_1 = arith.constant 0 : i32
    return %c0_i32, %c0_i32_0 : i32, i32
  }
  func.func @transform_12(%arg0: i32) -> (i32, i32, i32) {
    %c0_i32 = arith.constant 0 : i32
    %c0_i32_0 = arith.constant 0 : i32
    %c0_i32_1 = arith.constant 0 : i32
    return %arg0, %c0_i32, %c0_i32_0 : i32, i32, i32
  }
}

</mosaic_0001>

<bundles_post_ra>
// kernel: tpu_custom_call.1
= control target key start
LH: loop header
LB: loop body
LE: loop exit
PB: predicated region body
PF: predicated region fallthrough
CT: control target
= control target key end

     0   :  { %s2113_s0 = inlined_call_operand.vmem [shape: f32[2,8,32], index: 0, kind: input, shape index: {}]   ;;  %s2114_s1 = inlined_call_operand.vmem [shape: f32[1,32], index: 1, kind: input, shape index: {}]   ;;  %s2115_s2 = inlined_call_operand.vmem [shape: f32[1,32], index: 2, kind: input, shape index: {}]   ;;  %s2116_s3 = inlined_call_operand.vmem [shape: bf16[96,32], index: 3, kind: input, shape index: {}]   ;;  %s2117_s4 = inlined_call_operand.vmem [shape: bf16[32,32], index: 4, kind: input, shape index: {}]   ;;  %s2118_s5 = inlined_call_operand.vmem [shape: f32[1,32], index: 5, kind: input, shape index: {}]   ;;  %s2119_s6 = inlined_call_operand.vmem [shape: f32[1,32], index: 6, kind: input, shape index: {}]   ;;  %s2120_s7 = inlined_call_operand.vmem [shape: f32[1,32], index: 7, kind: input, shape index: {}]   ;;  %s2121_s8 = inlined_call_operand.vmem [shape: bf16[128,32], index: 8, kind: input, shape index: {}]   ;;  %s2122_s9 = inlined_call_operand.vmem [shape: f32[1,128], index: 9, kind: input, shape index: {}]   ;;  %s2123_s10 = inlined_call_operand.vmem [shape: bf16[32,128], index: 10, kind: input, shape index: {}]   ;;  %s2124_s11 = inlined_call_operand.vmem [shape: f32[1,32], index: 11, kind: input, shape index: {}]   ;;  %s2125_s12 = inlined_call_operand.hbm [shape: f32[2,8,32], index: 12, kind: output, shape index: {}]  }
   0x1   :  { %2126 = sst [smem:[#allocation6_spill]] %s2113_s0 }
   0x2   :  { %2127 = sst [smem:[#allocation7_spill]] %s2114_s1 }
   0x3   :  { %17 = vsyncpa [#allocation4], 0 }
   0x4   :  { %19 = vsyncpa [#allocation4 + $0x1], 0  ;;  %s1814_s21 = smov 0   ;;  %s1816_s22 = smov 0  }
   0x5   :  { %s1818_s23 = smov 0   ;;  %s1820_s24 = smov 0  }
   0x6 LB: > { %s1835_s25 = sadd.s32 4294967295, %s1730_s24   ;;  %s1391_s26 = sadd.s32 4294967294, %s1730_s24   ;;  %s1730_s24 = sphi %s1820_s24, %s2135_s24   ;;  %s1726_s23 = sphi %s1818_s23, %s2134_s23   ;;  %s1722_s22 = sphi %s1816_s22, %s2133_s22   ;;  %s1718_s21 = sphi %s1814_s21, %s2132_s21  }
   0x7   : > { %s1839_s27 = sadd.s32 1, %s1730_s24   ;;  %s289_s28 = sadd.s32 1, %s1726_s23 }
   0x8   : > { %s286_s29 = ssub.s32 %s1730_s24, %s1839_s27  ;;  %p299_p0 = scmp.ne.s32.totalorder %s1726_s23, %s1722_s22 }
   0x9   : > { %p287_p1 = scmp.eq.s32.totalorder %s286_s29, 0  ;;  %p300_p2 = scmp.eq.s32.totalorder %s1835_s25, 1 }
   0xa   : > { %p305_p3 = scmp.ne.s32.totalorder %s1722_s22, %s1718_s21  ;;  %p306_p4 = scmp.eq.s32.totalorder %s1391_s26, 1 }
   0xb   : > { %s1850_s30 = scalar_select %p287_p1, %s1726_s23, %s289_s28  }
   0xc   : > { %p1852_p5 = por %p300_p2, %p299_p0  ;;  %p1856_p6 = por %p306_p4, %p305_p3 }
   0xd   : > { %p1394_p7 = scmp.ge.s32.totalorder %s1730_s24, 1  ;;  %p364_p8 = scmp.lt.s32.totalorder %s1730_s24, 3 }
   0xf   : > { %p365_p9 = pnand %p1394_p7, %p364_p8 }
  0x10   : > { %p405_p10 = scmp.lt.s32.totalorder (!%p365_p9), %s1835_s25, 1  ;;  %s2130_s0 = sld [smem:[#allocation6_spill]] (!%p365_p9) }
  0x11   : > { %368 = sbr.rel (%p365_p9) target bundleno = 2946 (0xb82), region = 68  ;;  %s2131_s1 = sld [smem:[#allocation7_spill]] (!%p365_p9) }
  0x12   : > { %s1734_s18 = smov (!%p365_p9), 88   ;;  %s1736_s20 = smov (!%p365_p9), 96  }
  0x13   : > { %s1737_s26 = smov (!%p365_p9), 56   ;;  %s1738_s28 = smov (!%p365_p9), 64  }
  0x14   : > { %s1739_s29 = smov (!%p365_p9), 112   ;;  %s1742_s17 = smov (!%p365_p9), 104  }
  0x16   : > { %s406_s15 = scalar_select %p405_p10, %s1835_s25, 1  ;;  %vm454_vm0 = vcmask 261120   ;;  %v1630_v2 = vld [vmem:[%s2116_s3 + $0x28] sm:$0xff]   ;;  %v1732_v3 = vmov 0.0   ;;  %v1631_v5 = vld [vmem:[%s2116_s3 + $0x20] sm:$0xff]   ;;  %v1632_v7 = vld [vmem:[%s2116_s3 + $0x18] sm:$0xff]  }
  0x17   : > { %1475 = vmatprep.subr.bf16.mxu0 %v1732_v3  ;;  %1503 = vmatprep.subr.bf16.mxu1 %v1732_v3  ;;  %v533_v4 = vsel %vm454_vm0, %v1630_v2, 0  ;;  %v530_v6 = vsel %vm454_vm0, %v1631_v5, 0  ;;  %v527_v8 = vsel %vm454_vm0, %v1632_v7, 0  ;;  %v1633_v14 = vld [vmem:[%s2116_s3 + $0x10] sm:$0xff]   ;;  %v1634_v16 = vld [vmem:[%s2116_s3 + $0x8] sm:$0xff]   ;;  %vm1733_vm1 = vmmov 0  }
  0x18   : > { %s1396_s16 = sshll.u32 %s406_s15, 3  ;;  %1476 = vmatpush3.bf16.xpose.msra.mxu0 %v533_v4  ;;  %v524_v15 = vsel %vm454_vm0, %v1633_v14, 0  ;;  %1487 = vmatprep.mubr.msk.bf16.mxu0 %vm1733_vm1, %v1732_v3  ;;  %v521_v17 = vsel %vm454_vm0, %v1634_v16, 0  ;;  %v1635_v18 = vld [vmem:[%s2116_s3] sm:$0xff]   ;;  %vm581_vm2 = vcmask 64512   ;;  %s1740_s15 = smov 80  }
  0x19   : > { %s408_s19 = scalar_lea.vmem %s2130_s0, %s1396_s16  ;;  %1477 = vmatprep.subr.bf16.mxu0 %v1732_v3  ;;  %1505 = vmatprep.mubr.msk.bf16.mxu1 %vm1733_vm1, %v1732_v3  ;;  %v518_v19 = vsel %vm454_vm0, %v1635_v18, 0  ;;  %v1397_v24 = vld [vmem:[%s2131_s1] ss:$0 sm:$0xff]  ;;  %vm645_vm3 = vcmask 1043456   ;;  %s1741_s16 = smov 72   ;;  %vm805_vm4 = vcmask 130112  }
  0x1a   : > { %v1867_v0 = vld [vmem:[%s408_s19] sm:$0xff]  ;;  %s1735_s19 = smov 120   ;;  %vm921_vm5 = vcmask 195712   ;;  %vm1037_vm6 = vcmask 261312  }
  0x1b   : > { %v455_v1 = vsel %vm454_vm0, %v1867_v0, 0.0  ;;  %v1398_v26 = vld [vmem:[%s2115_s2] ss:$0 sm:$0xff] }
  0x1c   : > { %456 = vadd.xlane.f32.xlu0 %v455_v1 }
  0x20   : > { %1478 = vmatpush3.bf16.xpose.msra.mxu0 %v530_v6 }
  0x21   : > { %1479 = vmatprep.subr.bf16.mxu0 %v1732_v3 }
  0x28   : > { %1480 = vmatpush3.bf16.xpose.msra.mxu0 %v527_v8 }
  0x29   : > { %1481 = vmatprep.subr.bf16.mxu0 %v1732_v3 }
  0x30   : > { %1482 = vmatpush3.bf16.xpose.msra.mxu0 %v524_v15 }
  0x31   : > { %1483 = vmatprep.subr.bf16.mxu0 %v1732_v3 }
  0x38   : > { %1484 = vmatpush3.bf16.xpose.msra.mxu0 %v521_v17 }
  0x39   : > { %1485 = vmatprep.subr.bf16.mxu0 %v1732_v3 }
  0x40   : > { %1486 = vmatpush3.bf16.xpose.msra.mxu0 %v518_v19 }
  0x41   : > { %1491 = vmatprep.subr.bf16.mxu0 %v1732_v3 }
  0xa5   : > { %v457_v9 = vpop.xlane.xlu0 %456 }
  0xa6   : > { %v459_v10 = vmul.f32 0.03125, %v457_v9 }
  0xa8   : > { %v460_v11 = vsub.f32 %v1867_v0, %v459_v10 }
  0xaa   : > { %v461_v12 = vmul.f32 %v460_v11, %v460_v11 }
  0xac   : > { %v462_v13 = vsel %vm454_vm0, %v461_v12, 0.0 }
  0xad   : > { %463 = vadd.xlane.f32.xlu0 %v462_v13 }
 0x136   : > { %v464_v20 = vpop.xlane.xlu0 %463 }
 0x137   : > { %v465_v21 = vmul.f32 0.03125, %v464_v20 }
 0x139   : > { %v466_v22 = vadd.f32 1e-05, %v465_v21 }
 0x13b   : > { %1648 = vrsqrt.f32 %v466_v22 }
 0x148   : > { %v1649_v23 = vpop.eup %1648 }
 0x149   : > { %v468_v25 = vmul.f32 %v1649_v23, %v460_v11 }
 0x14b   : > { %v475_v27 = vmul.f32 %v1397_v24, %v468_v25 }
 0x14d   : > { %v482_v28 = vadd.f32 %v1398_v26, %v475_v27 }
 0x14f   : > { %v483_v29 = vpack.c.bf16 %v482_v28, %v482_v28 }
 0x151   : > { %1488 = vmatmul.mubr.msk.bf16.vlgmr.msra.gmra.mxu0 %vm454_vm0, %v483_v29 }
 0x152   : > { %1493 = vmatprep.mubr.msk.bf16.mxu0 %vm1733_vm1, %v1732_v3 }
 0x211   : > { %v569_v30 = vpop.f32.mrf.mxu0 }
 0x212   : > { %v575_v31 = vmul.f32 0.35355338, %v569_v30  ;;  %v1918_v32 = vpack.c.bf16 %v569_v30, %v569_v30 }
 0x213   : > { %v1489_v33 = vpop.f32.mrf.mxu0 }
 0x214   : > { %v1920_v34 = vpack.c.bf16 %v575_v31, %v575_v31  ;;  %693 = vrot.lane.b32.xlu1 %v1918_v32, %s1734_s18  ;;  %s1743_s18 = smov 48  }
 0x215   : > { %v572_v35 = vpop.f32.mrf.mxu0 }
 0x216   : > { %691 = vrot.lane.b32.xlu0 %v1920_v34, %s1735_s19  ;;  %s1744_s19 = smov 8  }
 0x217   : > { %v1490_v36 = vpop.f32.mrf.mxu0 }
 0x218   : > { %579 = vrot.lane.b32.xlu1 %v1918_v32, %s1736_s20  ;;  %s1745_s20 = smov 40  }
 0x286   : > { %v694_v37 = vpop.permute.xlu1 %693 }
 0x287   : > { %v699_v38 = vsel %vm581_vm2, %v694_v37, 0 }
 0x288   : > { %1504 = vmatpush3.bf16.xpose.msra.mxu1 %v699_v38  ;;  %v692_v41 = vpop.permute.xlu0 %691 }
 0x289   : > { %1509 = vmatprep.subr.bf16.mxu1 %v1732_v3 }
 0x28a   : > { %v580_v39 = vpop.permute.xlu1 %579 }
 0x28b   : > { %v586_v40 = vsel %vm581_vm2, %v580_v39, 0 }
 0x28c   : > { %1492 = vmatpush3.bf16.xpose.msra.mxu0 %v586_v40 }
 0x28d   : > { %1497 = vmatprep.subr.bf16.mxu0 %v1732_v3 }
 0x28f   : > { %1506 = vmatmul.mubr.msk.bf16.vlgmr.msra.gmra.mxu1 %vm581_vm2, %v692_v41 }
 0x290   : > { %1511 = vmatprep.mubr.msk.bf16.mxu1 %vm1733_vm1, %v1732_v3 }
 0x293   : > { %1494 = vmatmul.mubr.msk.bf16.vlgmr.msra.gmra.mxu0 %vm581_vm2, %v1920_v34 }
 0x294   : > { %1499 = vmatprep.mubr.msk.bf16.mxu0 %vm1733_vm1, %v1732_v3 }
 0x34f   : > { %v735_v42 = vpop.f32.mrf.mxu1 }
 0x350   : > { %v741_v43 = vsel %vm581_vm2, %v735_v42, -inf }
 0x351   : > { %742 = vmax.xlane.f32.xlu1 %v741_v43  ;;  %v1507_v44 = vpop.f32.mrf.mxu1 }
 0x353   : > { %v622_v45 = vpop.f32.mrf.mxu0  ;;  %v738_v46 = vpop.f32.mrf.mxu1 }
 0x354   : > { %v628_v47 = vsel %vm581_vm2, %v622_v45, -inf }
 0x355   : > { %v1508_v48 = vpop.f32.mrf.mxu1  ;;  %629 = vmax.xlane.f32.xlu0 %v628_v47  ;;  %v1495_v49 = vpop.f32.mrf.mxu0 }
 0x357   : > { %v625_v50 = vpop.f32.mrf.mxu0 }
 0x359   : > { %v1496_v51 = vpop.f32.mrf.mxu0 }
 0x362   : > { %753 = vrot.lane.b32.xlu1 %v1918_v32, %s1737_s26  ;;  %s1748_s26 = smov [#allocation3]  }
 0x366   : > { %640 = vrot.lane.b32.xlu1 %v1918_v32, %s1738_s28  ;;  %s1674_s28 = sshll.u32 %s1748_s26, 4  ;;  %s1675_s28 = int_to_ptr.vmem [resolvable:$false] %s1674_s28 }
 0x36a   : > { %807 = vrot.lane.b32.xlu1 %v1920_v34, %s1739_s29  ;;  %s1434_s29 = sshll.u32 %s1835_s25, 7 }
 0x36b   : > { %809 = vrot.lane.b32.xlu0 %v1918_v32, %s1740_s15  ;;  %s2071_s0 = scalar_lea.hbm %s2125_s12, %s1434_s29  ;;  %s1676_s29 = scalar_lea.vmem %s1675_s28, 256 }
 0x3da   : > { %v743_v52 = vpop.xlane.xlu1 %742 }
 0x3db   : > { %v744_v53 = vsub.f32 %v735_v42, %v743_v52 }
 0x3dd   : > { %v745_v54 = vmul.f32 1.442695, %v744_v53 }
 0x3de   : > { %v754_v55 = vpop.permute.xlu1 %753  ;;  %v630_v56 = vpop.xlane.xlu0 %629 }
 0x3df   : > { %1650 = vpow2.f32 %v745_v54  ;;  %v759_v57 = vsel %vm645_vm3, %v754_v55, 0  ;;  %v631_v58 = vsub.f32 %v622_v45, %v630_v56 }
 0x3e0   : > { %1510 = vmatpush3.bf16.msra.mxu1 %v759_v57 }
 0x3e1   : > { %v632_v59 = vmul.f32 1.442695, %v631_v58  ;;  %1515 = vmatprep.subr.bf16.mxu1 %v1732_v3 }
 0x3e2   : > { %v641_v60 = vpop.permute.xlu1 %640  ;;  %v810_v9 = vpop.permute.xlu0 %809 }
 0x3e3   : > { %1652 = vpow2.f32 %v632_v59  ;;  %v647_v61 = vsel %vm645_vm3, %v641_v60, 0  ;;  %v815_v12 = vsel %vm581_vm2, %v810_v9, 0  ;;  %v1636_v59 = vld [vmem:[%s2117_s4 + $0x8] sm:$0xff]  }
 0x3e4   : > { %1498 = vmatpush3.bf16.msra.mxu0 %v647_v61  ;;  %v1064_v60 = vsel %vm454_vm0, %v1636_v59, 0  ;;  %v1637_v61 = vld [vmem:[%s2117_s4] sm:$0xff]  }
 0x3e5   : > { %1527 = vmatprep.subr.bf16.mxu0 %v1732_v3 }
 0x3e6   : > { %v808_v4 = vpop.permute.xlu1 %807 }
 0x3ec   : > { %v1651_v62 = vpop.eup %1650 }
 0x3ed   : > { %v747_v63 = vsel %vm581_vm2, %v1651_v62, 0.0 }
 0x3ee   : > { %748 = vadd.xlane.f32.xlu1 %v747_v63 }
 0x3f0   : > { %v1653_v1 = vpop.eup %1652 }
 0x3f1   : > { %v634_v2 = vsel %vm581_vm2, %v1653_v1, 0.0 }
 0x3f2   : > { %635 = vadd.xlane.f32.xlu1 %v634_v2 }
 0x403   : > { %925 = vrot.lane.b32.xlu1 %v1918_v32, %s1741_s16  ;;  %s1746_s16 = smov 16  }
 0x407   : > { %923 = vrot.lane.b32.xlu1 %v1920_v34, %s1742_s17  ;;  %s1747_s17 = smov 24  }
 0x477   : > { %v749_v5 = vpop.xlane.xlu1 %748 }
 0x478   : > { %1654 = vrcp.f32 %v749_v5 }
 0x47b   : > { %v636_v6 = vpop.xlane.xlu1 %635 }
 0x47c   : > { %1656 = vrcp.f32 %v636_v6 }
 0x47f   : > { %v926_v14 = vpop.permute.xlu1 %925 }
 0x480   : > { %v931_v16 = vsel %vm581_vm2, %v926_v14, 0 }
 0x483   : > { %v924_v17 = vpop.permute.xlu1 %923 }
 0x485   : > { %v1655_v7 = vpop.eup %1654 }
 0x486   : > { %v751_v8 = vmul.f32 %v1655_v7, %v1651_v62  ;;  %v1061_v62 = vsel %vm454_vm0, %v1637_v61, 0 }
 0x488   : > { %v752_v10 = vpack.c.bf16 %v751_v8, %v751_v8 }
 0x489   : > { %v1657_v11 = vpop.eup %1656 }
 0x48a   : > { %1512 = vmatmul.mubr.msk.bf16.vlgmr.msra.gmra.mxu1 %vm581_vm2, %v752_v10  ;;  %v638_v13 = vmul.f32 %v1657_v11, %v1653_v1 }
 0x48b   : > { %1516 = vmatpush3.bf16.xpose.msra.mxu1 %v815_v12  ;;  %1517 = vmatprep.mubr.msk.bf16.mxu1 %vm1733_vm1, %v1732_v3 }
 0x48c   : > { %v639_v15 = vpack.c.bf16 %v638_v13, %v638_v13  ;;  %1521 = vmatprep.subr.bf16.mxu1 %v1732_v3  ;;  %v1414_v13 = vld [vmem:[%s2118_s5] ss:$0 sm:$0xff] }
 0x48e   : > { %1500 = vmatmul.mubr.msk.bf16.vlgmr.msra.gmra.mxu0 %vm581_vm2, %v639_v15 }
 0x48f   : > { %1528 = vmatpush3.bf16.xpose.msra.mxu0 %v931_v16  ;;  %1529 = vmatprep.mubr.msk.bf16.mxu0 %vm1733_vm1, %v1732_v3 }
 0x490   : > { %1539 = vmatprep.subr.bf16.mxu0 %v1732_v3 }
 0x492   : > { %1518 = vmatmul.mubr.msk.bf16.vlgmr.msra.gmra.mxu1 %vm581_vm2, %v808_v4 }
 0x493   : > { %1523 = vmatprep.mubr.msk.bf16.mxu1 %vm1733_vm1, %v1732_v3 }
 0x496   : > { %1530 = vmatmul.mubr.msk.bf16.vlgmr.msra.gmra.mxu0 %vm581_vm2, %v924_v17 }
 0x497   : > { %1543 = vmatprep.mubr.msk.bf16.mxu0 %vm1733_vm1, %v1732_v3  ;;  %1540 = vmatpush3.bf16.xpose.msra.mxu0 %v1064_v60 }
 0x498   : > { %1541 = vmatprep.subr.bf16.mxu0 %v1732_v3 }
 0x49f   : > { %1542 = vmatpush3.bf16.xpose.msra.mxu0 %v1061_v62 }
 0x4a0   : > { %1567 = vmatprep.subr.bf16.mxu0 %v1732_v3 }
 0x54a   : > { %v795_v18 = vpop.f32.mrf.mxu1 }
 0x54c   : > { %v1513_v19 = vpop.f32.mrf.mxu1 }
 0x54e   : > { %v683_v20 = vpop.f32.mrf.mxu0  ;;  %v798_v21 = vpop.f32.mrf.mxu1 }
 0x54f   : > { %689 = vst.msk [vmem:[#allocation2] sm:$0xff] %vm581_vm2, %v683_v20  ;;  %v1638_v21 = vld [vmem:[%s2121_s8 + $0x38] sm:$0xff]  }
 0x550   : > { %v1501_v22 = vpop.f32.mrf.mxu0  ;;  %v1514_v23 = vpop.f32.mrf.mxu1 }
 0x551   : > { %v1206_v22 = vsel %vm454_vm0, %v1638_v21, 0 }
 0x552   : > { %v686_v24 = vpop.f32.mrf.mxu0  ;;  %v851_v25 = vpop.f32.mrf.mxu1 }
 0x553   : > { %v857_v26 = vsel %vm581_vm2, %v851_v25, -inf  ;;  %v1640_v24 = vld [vmem:[%s2121_s8 + $0x28] sm:$0xff]  }
 0x554   : > { %858 = vmax.xlane.f32.xlu0 %v857_v26  ;;  %v1502_v27 = vpop.f32.mrf.mxu0  ;;  %v1519_v28 = vpop.f32.mrf.mxu1  ;;  %v1641_v26 = vld [vmem:[%s2121_s8 + $0x20] sm:$0xff]  }
 0x555   : > { %v1197_v27 = vsel %vm454_vm0, %v1641_v26, 0  ;;  %v1642_v28 = vld [vmem:[%s2121_s8 + $0x18] sm:$0xff]  }
 0x556   : > { %v854_v29 = vpop.f32.mrf.mxu1  ;;  %v967_v30 = vpop.f32.mrf.mxu0 }
 0x557   : > { %v973_v31 = vsel %vm581_vm2, %v967_v30, -inf  ;;  %v1194_v29 = vsel %vm454_vm0, %v1642_v28, 0 }
 0x558   : > { %v1520_v33 = vpop.f32.mrf.mxu1  ;;  %974 = vmax.xlane.f32.xlu1 %v973_v31  ;;  %v1531_v34 = vpop.f32.mrf.mxu0 }
 0x55a   : > { %v970_v35 = vpop.f32.mrf.mxu0 }
 0x55c   : > { %v1532_v36 = vpop.f32.mrf.mxu0 }
 0x55d   : > { %v1643_v36 = vld [vmem:[%s2121_s8 + $0x10] sm:$0xff]  }
 0x569   : > { %869 = vrot.lane.b32.xlu1 %v1918_v32, %s1743_s18 }
 0x56d   : > { %802 = vrot.lane.b32.xlu1 %v795_v18, %s1744_s19  ;;  %s402_s19 = sand.u32 1, %s1722_s22  }
 0x56e   : > { %s1319_s25 = scalar_lea.sflag [#allocation4], %s402_s19 }
 0x5dd   : > { %v859_v37 = vpop.xlane.xlu0 %858 }
 0x5de   : > { %v860_v38 = vsub.f32 %v851_v25, %v859_v37  ;;  %v1200_v25 = vsel %vm454_vm0, %v1640_v24, 0  ;;  %v1191_v37 = vsel %vm454_vm0, %v1643_v36, 0 }
 0x5e0   : > { %v861_v39 = vmul.f32 1.442695, %v860_v38  ;;  %v1644_v38 = vld [vmem:[%s2121_s8 + $0x8] sm:$0xff]  }
 0x5e1   : > { %v975_v40 = vpop.xlane.xlu1 %974 }
 0x5e2   : > { %1658 = vpow2.f32 %v861_v39  ;;  %v976_v41 = vsub.f32 %v967_v30, %v975_v40  ;;  %v1188_v39 = vsel %vm454_vm0, %v1644_v38, 0  ;;  %v1645_v40 = vld [vmem:[%s2121_s8] sm:$0xff]  }
 0x5e4   : > { %v977_v42 = vmul.f32 1.442695, %v976_v41  ;;  %v1185_v41 = vsel %vm454_vm0, %v1645_v40, 0 }
 0x5e5   : > { %v870_v43 = vpop.permute.xlu1 %869 }
 0x5e6   : > { %1660 = vpow2.f32 %v977_v42  ;;  %v875_v44 = vsel %vm645_vm3, %v870_v43, 0 }
 0x5e7   : > { %1522 = vmatpush3.bf16.msra.mxu1 %v875_v44 }
 0x5e8   : > { %1533 = vmatprep.subr.bf16.mxu1 %v1732_v3 }
 0x5e9   : > { %v803_v45 = vpop.permute.xlu1 %802 }
 0x5ea   : > { %806 = vst.msk [vmem:[#allocation2] sm:$0xff] %vm805_vm4, %v803_v45 }
 0x5ef   : > { %v1659_v46 = vpop.eup %1658 }
 0x5f0   : > { %v863_v47 = vsel %vm581_vm2, %v1659_v46, 0.0 }
 0x5f1   : > { %864 = vadd.xlane.f32.xlu0 %v863_v47 }
 0x5f3   : > { %v1661_v48 = vpop.eup %1660 }
 0x5f4   : > { %v979_v49 = vsel %vm581_vm2, %v1661_v48, 0.0 }
 0x5f5   : > { %980 = vadd.xlane.f32.xlu0 %v979_v49 }
 0x60b   : > { %985 = vrot.lane.b32.xlu0 %v1918_v32, %s1745_s20  ;;  %s1395_s20 = sshll.u32 %s402_s19, 3 }
 0x60c   : > { %s404_s15 = scalar_lea.vmem [#allocation3], %s1395_s20 }
 0x67a   : > { %v865_v50 = vpop.xlane.xlu0 %864 }
 0x67b   : > { %1662 = vrcp.f32 %v865_v50 }
 0x67e   : > { %v981_v51 = vpop.xlane.xlu0 %980 }
 0x67f   : > { %1664 = vrcp.f32 %v981_v51 }
 0x682   : > { %v986_v54 = vpop.permute.xlu0 %985 }
 0x683   : > { %v991_v57 = vsel %vm645_vm3, %v986_v54, 0  ;;  %v1420_v54 = vld [vmem:[%s2122_s9] ss:$0 sm:$0xff] }
 0x688   : > { %v1663_v52 = vpop.eup %1662 }
 0x689   : > { %v867_v53 = vmul.f32 %v1663_v52, %v1659_v46  ;;  %v1418_v46 = vld [vmem:[%s2119_s6] ss:$0 sm:$0xff]  ;;  %v1646_v52 = vld [vmem:[%s2123_s10 + $0x8] sm:$0xff]  }
 0x68b   : > { %v868_v55 = vpack.c.bf16 %v867_v53, %v867_v53  ;;  %v1647_v53 = vld [vmem:[%s2123_s10] sm:$0xff]  }
 0x68c   : > { %v1665_v56 = vpop.eup %1664 }
 0x68d   : > { %1524 = vmatmul.mubr.msk.bf16.vlgmr.msra.gmra.mxu1 %vm581_vm2, %v868_v55  ;;  %v983_v58 = vmul.f32 %v1665_v56, %v1661_v48  ;;  %v1419_v48 = vld [vmem:[%s2120_s7] ss:$0 sm:$0xff] }
 0x68e   : > { %1534 = vmatpush3.bf16.msra.mxu1 %v991_v57  ;;  %1535 = vmatprep.mubr.msk.bf16.mxu1 %vm1733_vm1, %v1732_v3 }
 0x68f   : > { %1547 = vmatprep.subr.bf16.mxu1 %v1732_v3  ;;  %v984_v32 = vpack.c.bf16 %v983_v58, %v983_v58 }
 0x695   : > { %1536 = vmatmul.mubr.msk.bf16.vlgmr.msra.gmra.mxu1 %vm581_vm2, %v984_v32 }
 0x696   : > { %1563 = vmatprep.mubr.msk.bf16.mxu1 %vm1733_vm1, %v1732_v3  ;;  %1548 = vmatpush3.bf16.xpose.msra.mxu1 %v1206_v22 }
 0x697   : > { %1549 = vmatprep.subr.bf16.mxu1 %v1732_v3 }
 0x74d   : > { %v911_v63 = vpop.f32.mrf.mxu1 }
 0x74e   : > { %918 = vrot.lane.b32.xlu1 %v911_v63, %s1746_s16  ;;  %s1332_s16 = sshll.u32 %s404_s15, 4  ;;  %s2073_s16 = int_to_ptr.vmem [resolvable:$true] %s1332_s16 }
 0x74f   : > { %v1525_v1 = vpop.f32.mrf.mxu1  ;;  %s1670_s20 = scalar_lea.vmem %s2073_s16, 128  ;;  %p1677_p0 = scmp.lt.s32.totalorder %s2073_s16, %s1675_s28 }
 0x750   : > { %p1671_p11 = scmp.ne.s32.totalorder %s2073_s16, %s1670_s20  ;;  %p1678_p1 = scmp.lt.s32.totalorder %s1676_s29, %s1670_s20 }
 0x751   : > { %v914_v2 = vpop.f32.mrf.mxu1 }
 0x752   : > { %p1672_p12 = pnand %p1671_p11, %p1852_p5  ;;  %p1679_p2 = por %p1678_p1, %p1677_p0 }
 0x753   : > { %v1526_v4 = vpop.f32.mrf.mxu1 }
 0x754   : > { %p1673_p13 = pneg %p1672_p12 }
 0x755   : > { %v1027_v5 = vpop.f32.mrf.mxu1 }
 0x756   : > { %1034 = vrot.lane.b32.xlu0 %v1027_v5, %s1747_s17  ;;  %p1680_p3 = pnand %p1679_p2, %p1673_p13 }
 0x757   : > { %v1537_v6 = vpop.f32.mrf.mxu1 }
 0x758   : > { %v1430_v6 = vld [vmem:[%s2124_s11] ss:$0 sm:$0xff] }
 0x759   : > { %v1030_v7 = vpop.f32.mrf.mxu1 }
 0x75b   : > { %v1538_v8 = vpop.f32.mrf.mxu1 }
 0x7c0   : > { %v919_v9 = vpop.permute.xlu1 %918 }
 0x7c1   : > { %922 = vst.msk [vmem:[#allocation2] sm:$0xff] %vm921_vm5, %v919_v9 }
 0x7c8   : > { %v1035_v10 = vpop.permute.xlu0 %1034 }
 0x7c9   : > { %1038 = vst.msk [vmem:[#allocation2] sm:$0xff] %vm1037_vm6, %v1035_v10 }
 0x7d0   : > { %v1039_v11 = vld [vmem:[#allocation2] sm:$0xff] }
 0x7d1   : > { %v1040_v12 = vpack.c.bf16 %v1039_v11, %v1039_v11 }
 0x7d3   : > { %1544 = vmatmul.mubr.msk.bf16.vlgmr.msra.gmra.mxu0 %vm454_vm0, %v1040_v12 }
 0x7d4   : > { %1571 = vmatprep.mubr.msk.bf16.mxu0 %vm1733_vm1, %v1732_v3  ;;  %1568 = vmatpush3.bf16.xpose.msra.mxu0 %v1646_v52 }
 0x7d5   : > { %1569 = vmatprep.subr.bf16.mxu0 %v1732_v3 }
 0x7dc   : > { %1570 = vmatpush3.bf16.xpose.msra.mxu0 %v1647_v53 }
 0x893   : > { %v1100_v14 = vpop.f32.mrf.mxu0 }
 0x894   : > { %v1101_v15 = vadd.f32 %v1414_v13, %v1100_v14 }
 0x895   : > { %v1545_v16 = vpop.f32.mrf.mxu0 }
 0x896   : > { %v2000_v17 = vadd.f32 %v1101_v15, %v1867_v0  ;;  %v1639_v0 = vld [vmem:[%s2121_s8 + $0x30] sm:$0xff]  }
 0x897   : > { %v1103_v18 = vpop.f32.mrf.mxu0  ;;  %v1203_v23 = vsel %vm454_vm0, %v1639_v0, 0 }
 0x898   : > { %v1107_v19 = vsel %vm454_vm0, %v2000_v17, 0.0  ;;  %1550 = vmatpush3.bf16.xpose.msra.mxu1 %v1203_v23 }
 0x899   : > { %1108 = vadd.xlane.f32.xlu1 %v1107_v19  ;;  %v1546_v20 = vpop.f32.mrf.mxu0  ;;  %1551 = vmatprep.subr.bf16.mxu1 %v1732_v3 }
 0x8a0   : > { %1552 = vmatpush3.bf16.xpose.msra.mxu1 %v1200_v25 }
 0x8a1   : > { %1553 = vmatprep.subr.bf16.mxu1 %v1732_v3 }
 0x8a8   : > { %1554 = vmatpush3.bf16.xpose.msra.mxu1 %v1197_v27 }
 0x8a9   : > { %1555 = vmatprep.subr.bf16.mxu1 %v1732_v3 }
 0x8b0   : > { %1556 = vmatpush3.bf16.xpose.msra.mxu1 %v1194_v29 }
 0x8b1   : > { %1557 = vmatprep.subr.bf16.mxu1 %v1732_v3 }
 0x8b8   : > { %1558 = vmatpush3.bf16.xpose.msra.mxu1 %v1191_v37 }
 0x8b9   : > { %1559 = vmatprep.subr.bf16.mxu1 %v1732_v3 }
 0x8c0   : > { %1560 = vmatpush3.bf16.xpose.msra.mxu1 %v1188_v39 }
 0x8c1   : > { %1561 = vmatprep.subr.bf16.mxu1 %v1732_v3 }
 0x8c8   : > { %1562 = vmatpush3.bf16.xpose.msra.mxu1 %v1185_v41 }
 0x922   : > { %v1109_v30 = vpop.xlane.xlu1 %1108 }
 0x923   : > { %v1110_v31 = vmul.f32 0.03125, %v1109_v30 }
 0x925   : > { %v1111_v33 = vsub.f32 %v2000_v17, %v1110_v31 }
 0x927   : > { %v1112_v34 = vmul.f32 %v1111_v33, %v1111_v33 }
 0x929   : > { %v1113_v35 = vsel %vm454_vm0, %v1112_v34, 0.0 }
 0x92a   : > { %1114 = vadd.xlane.f32.xlu0 %v1113_v35 }
 0x9b3   : > { %v1115_v42 = vpop.xlane.xlu0 %1114 }
 0x9b4   : > { %v1116_v43 = vmul.f32 0.03125, %v1115_v42 }
 0x9b6   : > { %v1117_v44 = vadd.f32 1e-05, %v1116_v43 }
 0x9b8   : > { %1666 = vrsqrt.f32 %v1117_v44 }
 0x9c5   : > { %v1667_v45 = vpop.eup %1666 }
 0x9c6   : > { %v1119_v47 = vmul.f32 %v1667_v45, %v1111_v33 }
 0x9c8   : > { %v1126_v49 = vmul.f32 %v1418_v46, %v1119_v47 }
 0x9ca   : > { %v1133_v50 = vadd.f32 %v1419_v48, %v1126_v49 }
 0x9cc   : > { %v1134_v51 = vpack.c.bf16 %v1133_v50, %v1133_v50 }
 0x9ce   : > { %1564 = vmatmul.mubr.msk.bf16.vlgmr.msra.gmra.mxu1 %vm454_vm0, %v1134_v51 }
 0xa8e   : > { %v1242_v55 = vpop.f32.mrf.mxu1 }
 0xa8f   : > { %v1243_v56 = vadd.f32 %v1420_v54, %v1242_v55 }
 0xa90   : > { %v1565_v57 = vpop.f32.mrf.mxu1 }
 0xa91   : > { %v1249_v58 = vmul.f32 0.044715, %v1243_v56  ;;  %v1248_v1 = vmul.f32 0.5, %v1243_v56 }
 0xa92   : > { %v1245_v32 = vpop.f32.mrf.mxu1 }
 0xa93   : > { %v1250_v59 = vmul.f32 %v1249_v58, %v1243_v56 }
 0xa94   : > { %v1566_v60 = vpop.f32.mrf.mxu1 }
 0xa95   : > { %v1251_v61 = vmul.f32 %v1250_v59, %v1243_v56 }
 0xa97   : > { %v1252_v3 = vadd.f32 %v1251_v61, %v1243_v56 }
 0xa99   : > { %v1253_v62 = vmul.f32 0.7978846, %v1252_v3 }
 0xa9b   : > { %1668 = vtanh.f32 %v1253_v62 }
 0xaa8   : > { %v1669_v63 = vpop.eup %1668 }
 0xaa9   : > { %v1255_v2 = vadd.f32 1.0, %v1669_v63 }
 0xaab   : > { %v1256_v4 = vmul.f32 %v1255_v2, %v1248_v1 }
 0xaad   : > { %v1257_v5 = vpack.c.bf16 %v1256_v4, %v1256_v4 }
 0xaaf   : > { %1572 = vmatmul.mubr.bf16.vlgmr.msra.gmra.mxu0 %v1257_v5 }
 0xb6f   : > { %v1310_v7 = vpop.f32.mrf.mxu0 }
 0xb70   : > { %v1311_v8 = vadd.f32 %v1430_v6, %v1310_v7 }
 0xb71   : > { %v1573_v9 = vpop.f32.mrf.mxu0 }
 0xb72   : > { %v1316_v10 = vadd.f32 %v1311_v8, %v2000_v17 }
 0xb73   : > { %v1313_v11 = vpop.f32.mrf.mxu0 }
 0xb74   : > { %1317 = vst.msk [vmem:[%s404_s15] sm:$0xff] %vm454_vm0, %v1316_v10 }
 0xb75   : > { %v1574_v12 = vpop.f32.mrf.mxu0 }
 0xb76   : > { %1683 = shalt.err (!%p1680_p3)
}
 0xb77   : > { %s1684_s15 = scalar_lea.hbm %s2071_s0, 128  ;;  %s1688_s18 = scalar_lea.hbm %s2125_s12, 256 }
 0xb78   : > { %p1685_p4 = scmp.ne.s32.totalorder %s2071_s0, %s1684_s15  ;;  %p1689_p9 = scmp.lt.s32.totalorder %s2071_s0, %s2125_s12 }
 0xb79   : > { %p1690_p10 = scmp.lt.s32.totalorder %s1688_s18, %s1684_s15 }
 0xb7a   : > { %p1686_p7 = pnand %p1685_p4, %p1852_p5 }
 0xb7b   : > { %p1691_p11 = por %p1690_p10, %p1689_p9 }
 0xb7c   : > { %p1687_p8 = pneg %p1686_p7 }
 0xb7e   : > { %p1692_p12 = pnand %p1691_p11, %p1687_p8 }
 0xb80   : > { %1695 = shalt.err (!%p1692_p12)
}
 0xb81   : > { %1575 = dma.vmem_to_hbm [thread:$0]  (%p1852_p5), %s2073_s16, 128, %s2071_s0, %s1319_s25  }
 0xb82 PF: > { %p1581_p13 = scmp.ge.s32.totalorder %s1730_s24, 2  ;;  %s1344_s20 = sand.u32 1, %s1718_s21  }
 0xb83   : > { %s1345_s1 = scalar_lea.sflag [#allocation4], %s1344_s20 }
 0xb84   : > { %p1578_p0 = pnand %p1581_p13, %p1856_p6 }
 0xb86   : > { %p1579_p1 = pneg %p1578_p0 }
 0xb88   : > { %1713 = dma.done.wait (%p1579_p1), %s1345_s1, 128  }
 0xb89   : > { %1715 = vsyncadd (%p1579_p1), %s1345_s1, 4294967168  ;;  %p22_p2 = scmp.ge.s32.totalorder %s1839_s27, 4   ;;  %s2132_s21 = smov %s1722_s22 }
 0xb8a   : > { %s2133_s22 = smov %s1726_s23  ;;  %s2134_s23 = smov %s1850_s30 }
 0xb8b   : > { %s2135_s24 = smov %s1839_s27  ;;  %24 = sbr.rel (!%p22_p2) target bundleno = 6 (0x6), region = 103 }
 0xb90   :  { %1350 = vsyncpa [#allocation4], 1 }
 0xb91   :  { %1352 = vsyncpa [#allocation4 + $0x1], 1 }

</bundles_post_ra>
